<compile_context>
chip_gen: v7x
topology: tpu7x:2x2x1
jax: 0.10.0
libtpu: 0.0.40
codegen_flags: <defaults>
</compile_context>

<pallas_src>
import math
import numpy as np
import jax
import jax.numpy as jnp
from jax.experimental import pallas as pl
from jax.experimental.pallas import tpu as pltpu


def _proj_kernel(x_ref, w_ref, b_ref, o_ref):
    # x_ref: (tm, Em) f32 -- cast to bf16 here (free under the DMA-bound step)
    # w_ref: (Em, Pm) bf16 resident, b_ref: (1, Pm) f32 resident
    # o_ref: (tm, Pm) bf16 -- Pm multiple of 128 => unmasked, lane-dense stores
    x = x_ref[...].astype(jnp.bfloat16)
    acc = jnp.dot(x, w_ref[...], preferred_element_type=jnp.float32)
    o_ref[...] = (acc + b_ref[...]).astype(o_ref.dtype)


def _round_up(v, m):
    return ((v + m - 1) // m) * m


def patch_expand_proj(x2d, weight, bias, *, max_tm=8192,
                      out_dtype=jnp.bfloat16):
    """y2d[n, :] = x2d[n, :] @ weight + bias, tiled on the MXU.

    x2d: (N, E) f32, weight: (E, P) (transposed nn.Linear weight), bias: (P,).
    Returns (N, P) in out_dtype (bf16 by default; precision is already
    bf16-limited by the matmul inputs).
    """
    N, E = x2d.shape
    P = weight.shape[1]

    # Row-merge factor R so that BOTH R*E and R*P are multiples of 128.
    rE = 128 // math.gcd(E, 128)
    rP = 128 // math.gcd(P, 128)
    R = rE * rP // math.gcd(rE, rP)            # lcm(rE, rP)
    if R > 8 or (R * E) * (R * P) * 2 > (4 << 20):
        # TODO(synk): fallback is correct but may hit masked vst.msk stores
        # when P is not a multiple of 128; add a lane-padding path if needed.
        R = 1
    Em, Pm = R * E, R * P

    # Pad N only up to a multiple of R (at most R-1 zero rows); the ragged
    # last grid block along the merged-row axis is handled by Pallas.
    N_r = _round_up(N, R)
    if N_r != N:
        x2d = jnp.pad(x2d, ((0, N_r - N), (0, 0)))
    M = N_r // R
    xm = x2d.reshape(M, Em)                    # contiguous row-merge: free

    # Row-tile sizing: large tiles for HBM roofline; >=2 (even) tiles when
    # there is enough work so the "parallel" axis lands on both v7x cores.
    n_tiles = pl.cdiv(M, max_tm)
    if M >= 1024:
        n_tiles = max(n_tiles, 2)
        if n_tiles % 2:
            n_tiles += 1
    tm = min(_round_up(pl.cdiv(M, n_tiles), 16), _round_up(M, 16))
    n_tiles = pl.cdiv(M, tm)

    if R == 1:
        wm, bm = weight, bias
    else:
        wm = jnp.kron(jnp.eye(R, dtype=weight.dtype), weight)  # block-diag (Em, Pm)
        bm = jnp.tile(bias, R)
    wm = wm.astype(jnp.bfloat16)
    bm = bm.reshape(1, Pm).astype(jnp.float32)

    # Explicit VMEM ceiling: keeps big tiles legal on v5e's 16 MiB default
    # scoped limit while staying under v7x's 64 MiB physical VMEM.
    out_bytes = np.dtype(out_dtype).itemsize
    vmem_bytes = 2 * tm * (Em * 4 + Pm * out_bytes) + 2 * Em * Pm * 2 + Pm * 4
    vmem_limit = int(min(max(2 * vmem_bytes, 32 << 20), 48 << 20))

    ym = pl.pallas_call(
        _proj_kernel,
        out_shape=jax.ShapeDtypeStruct((M, Pm), out_dtype),
        grid_spec=pltpu.PrefetchScalarGridSpec(
            num_scalar_prefetch=0,
            grid=(n_tiles,),
            in_specs=[
                pl.BlockSpec((tm, Em), lambda i: (i, 0)),
                pl.BlockSpec((Em, Pm), lambda i: (0, 0)),   # weight resident
                pl.BlockSpec((1, Pm), lambda i: (0, 0)),    # bias resident
            ],
            out_specs=pl.BlockSpec((tm, Pm), lambda i: (i, 0)),
        ),
        compiler_params=pltpu.CompilerParams(
            dimension_semantics=("parallel",),              # both TCs on v7x
            vmem_limit_bytes=vmem_limit,
        ),
    )(xm, wm, bm)

    y2d = ym.reshape(M * R, P)                 # contiguous row un-merge: free
    if M * R != N:
        y2d = y2d[:N]
    return y2d


def patch_expand_3d(x, weight, bias, patch_size, out_chans, *, max_tm=8192,
                    out_dtype=jnp.bfloat16):
    """Forward pass of PatchExpand3d.

    x: (B, D, H, W, E) channel-last tokens (the layout nn.Linear acts on).
    weight: (E, P) with P = out_chans*p0*p1*p2 (transposed nn.Linear weight).
    bias: (P,)
    returns: (B, out_chans, D*p0, H*p1, W*p2)  -- NCDHW, like PyTorch.
    """
    p0, p1, p2 = patch_size
    B, D, H, W, E = x.shape

    y2d = patch_expand_proj(x.reshape(B * D * H * W, E), weight, bias,
                            max_tm=max_tm, out_dtype=out_dtype)

    # rearrange 'b d h w (p0 p1 p2 c) -> b c (d p0) (h p1) (w p2)'
    # Runs on bf16 data (half the HBM bytes of an f32 transpose pass).
    # TODO(synk): for consumers that accept channel-last output, skip this
    # transpose entirely -- it is a full extra HBM read+write of (N, P).
    y = y2d.reshape(B, D, H, W, p0, p1, p2, out_chans)
    y = jnp.transpose(y, (0, 7, 1, 4, 2, 5, 3, 6))
    return y.reshape(B, out_chans, D * p0, H * p1, W * p2)


if __name__ == "__main__":
    patch_size = (4, 4, 4)
    out_chans = 1
    embed_dim = 32
    B, D, H, W = 2, 2, 4, 5                       # N = 80 tokens
    P = out_chans * int(np.prod(patch_size))      # 64 -> R = 4 (Em=128, Pm=256)

    key = jax.random.PRNGKey(0)
    kx, kw, kb = jax.random.split(key, 3)
    x = jax.random.normal(kx, (B, D, H, W, embed_dim), dtype=jnp.float32)
    # nn.Linear(embed_dim, P): weight (P, E), bias (P,). Stored transposed (E, P).
    weight = (jax.random.normal(kw, (embed_dim, P), dtype=jnp.float32)
              * (1.0 / np.sqrt(embed_dim)))
    bias = jax.random.normal(kb, (P,), dtype=jnp.float32) * 0.01

    # Reference in plain JAX (same bf16 inputs, f32 accumulation, bf16 output).
    xb = x.reshape(-1, embed_dim).astype(jnp.bfloat16)
    wb = weight.astype(jnp.bfloat16)
    ref2d = (jnp.dot(xb, wb, preferred_element_type=jnp.float32)
             + bias).astype(jnp.bfloat16)
    p0, p1, p2 = patch_size
    ref = ref2d.reshape(B, D, H, W, p0, p1, p2, out_chans)
    ref = jnp.transpose(ref, (0, 7, 1, 4, 2, 5, 3, 6)).reshape(
        B, out_chans, D * p0, H * p1, W * p2)
    ref = np.asarray(jax.block_until_ready(ref)).astype(np.float32)

    # Run once with the default (single tile) and once with a forced
    # multi-tile grid to exercise the pipelined + ragged-last-block path.
    for max_tm in (8192, 16):
        out = patch_expand_3d(x, weight, bias, patch_size, out_chans,
                              max_tm=max_tm)
        out = jax.block_until_ready(out)
        assert out.shape == (B, out_chans, D * p0, H * p1, W * p2), out.shape
        np.testing.assert_allclose(np.asarray(out).astype(np.float32), ref,
                                   rtol=1e-2, atol=1e-2)

    print("KERNEL_OK")
</pallas_src>

<mosaic_0001>
module attributes {stable_mosaic.version = 11 : i64} {
  func.func @_proj_kernel(%arg0: i32, %arg1: memref<32x128xf32, #tpu.memory_space<vmem>>, %arg2: memref<128x256xbf16, #tpu.memory_space<vmem>>, %arg3: memref<1x256xf32, #tpu.memory_space<vmem>>, %arg4: memref<32x256xbf16, #tpu.memory_space<vmem>>) attributes {dimension_semantics = [#tpu.dimension_semantics<parallel>], iteration_bounds = array<i64: 1>, scalar_prefetch = 0 : i64, scratch_operands = 0 : i64, tpu.core_type = #tpu.core_type<tc>, window_params = [{transform_indices = @transform_0, window_bounds = array<i64: 32, 128>}, {pipeline_mode = #tpu.pipeline_mode<synchronous>, transform_indices = @transform_1, window_bounds = array<i64: 128, 256>}, {pipeline_mode = #tpu.pipeline_mode<synchronous>, transform_indices = @transform_2, window_bounds = array<i64: 1, 256>}, {transform_indices = @transform_3, window_bounds = array<i64: 32, 256>}]} {
    %c0 = arith.constant 0 : index
    %c0_0 = arith.constant 0 : index
    %0 = vector.load %arg1[%c0, %c0_0] : memref<32x128xf32, #tpu.memory_space<vmem>>, vector<32x128xf32>
    %1 = arith.truncf %0 : vector<32x128xf32> to vector<32x128xbf16>
    %c0_1 = arith.constant 0 : index
    %c0_2 = arith.constant 0 : index
    %2 = vector.load %arg2[%c0_1, %c0_2] : memref<128x256xbf16, #tpu.memory_space<vmem>>, vector<128x256xbf16>
    %cst = arith.constant dense<0.000000e+00> : vector<32x256xf32>
    %3 = tpu.matmul %1, %2, %cst {dimension_numbers = #tpu.dot_dimension_numbers<[1], [0], [0], [1], [0, 0, 1, 1], [], []>} : vector<32x128xbf16>, vector<128x256xbf16>, vector<32x256xf32> -> vector<32x256xf32>
    %c0_3 = arith.constant 0 : index
    %c0_4 = arith.constant 0 : index
    %4 = vector.load %arg3[%c0_3, %c0_4] : memref<1x256xf32, #tpu.memory_space<vmem>>, vector<1x256xf32>
    %5 = vector.broadcast %4 : vector<1x256xf32> to vector<32x256xf32>
    %6 = arith.addf %3, %5 : vector<32x256xf32>
    %7 = arith.truncf %6 : vector<32x256xf32> to vector<32x256xbf16>
    %c0_5 = arith.constant 0 : index
    %c0_6 = arith.constant 0 : index
    %8 = vector.load %arg4[%c0_5, %c0_6] : memref<32x256xbf16, #tpu.memory_space<vmem>>, vector<32x256xbf16>
    tpu.vector_store %arg4[%c0_5, %c0_6], %7 {strides = array<i32>} : memref<32x256xbf16, #tpu.memory_space<vmem>>, vector<32x256xbf16>,
    return
  }
  func.func @transform_0(%arg0: i32) -> (i32, i32) {
    %c0_i32 = arith.constant 0 : i32
    %c0_i32_0 = arith.constant 0 : i32
    return %arg0, %c0_i32 : i32, i32
  }
  func.func @transform_1(%arg0: i32) -> (i32, i32) {
    %c0_i32 = arith.constant 0 : i32
    %c0_i32_0 = arith.constant 0 : i32
    %c0_i32_1 = arith.constant 0 : i32
    return %c0_i32, %c0_i32_0 : i32, i32
  }
  func.func @transform_2(%arg0: i32) -> (i32, i32) {
    %c0_i32 = arith.constant 0 : i32
    %c0_i32_0 = arith.constant 0 : i32
    %c0_i32_1 = arith.constant 0 : i32
    return %c0_i32, %c0_i32_0 : i32, i32
  }
  func.func @transform_3(%arg0: i32) -> (i32, i32) {
    %c0_i32 = arith.constant 0 : i32
    %c0_i32_0 = arith.constant 0 : i32
    return %arg0, %c0_i32 : i32, i32
  }
}

</mosaic_0001>

<bundles_post_ra>
// kernel: tpu_custom_call.1
= control target key start
LH: loop header
LB: loop body
LE: loop exit
PB: predicated region body
PF: predicated region fallthrough
CT: control target
= control target key end

     0   :  { %8 = vsyncpa [#allocation3], 0  ;;  %s473_s0 = inlined_call_operand.hbm [shape: f32[20,128], index: 0, kind: input, shape index: {}]   ;;  %s474_s1 = inlined_call_operand.hbm [shape: bf16[128,256], index: 1, kind: input, shape index: {}]   ;;  %s475_s2 = inlined_call_operand.vmem [shape: f32[1,256], index: 2, kind: input, shape index: {}]   ;;  %s476_s3 = inlined_call_operand.hbm [shape: bf16[20,256], index: 3, kind: output, shape index: {}]  }
   0x1   :  { %9 = vsyncpa [#allocation6], 0 }
   0x2   :  { %10 = vsyncpa [#allocation4], 0 }
   0x3   :  { %15 = vsyncadd [#allocation3], 128  ;;  %s399_s12 = smov [#allocation2]   ;;  %s327_s16 = scalar_lea.hbm %s473_s0, 384 }
   0x4   :  { %s16_s13 = sshll.u32 %s399_s12, 4  ;;  %p328_p0 = scmp.ne.s32.totalorder %s473_s0, %s327_s16  ;;  %s17_s13 = int_to_ptr.vmem [resolvable:$true] %s16_s13 }
   0x5   :  { %p331_p1 = scmp.lt.u32.totalorder %s327_s16, %s473_s0 }
   0x7   :  { %p333_p2 = pnand %p331_p1, %p328_p0 }
   0x9   :  { %336 = shalt.err (!%p333_p2)
}
   0xa   :  { %s337_s21 = scalar_lea.vmem %s17_s13, 384  ;;  %s341_s22 = scalar_lea.vmem %s17_s13, 512 }
   0xb   :  { %p338_p3 = scmp.ne.s32.totalorder %s17_s13, %s337_s21  ;;  %p342_p4 = scmp.lt.s32.totalorder %s17_s13, %s17_s13 }
   0xc   :  { %p343_p5 = scmp.lt.s32.totalorder %s341_s22, %s337_s21 }
   0xe   :  { %p344_p6 = por %p343_p5, %p342_p4 }
  0x10   :  { %p345_p7 = pnand %p344_p6, %p338_p3 }
  0x12   :  { %348 = shalt.err (!%p345_p7)
}
  0x13   :  { %s400_s23 = smov 128   ;;  %s401_s24 = smov 8  }
  0x14   :  { %22 = dma.hbm_to_vmem [thread:$0]  %s473_s0, 384, %s17_s13, [#allocation3], %s400_s23, %s400_s23, %s401_s24  }
  0x15   :  { %s402_s27 = smov [#allocation5]   ;;  %s349_s4 = scalar_lea.hbm %s474_s1, 2048 }
  0x16   :  { %s28_s28 = sshll.u32 %s402_s27, 4  ;;  %p350_p8 = scmp.ne.s32.totalorder %s474_s1, %s349_s4  ;;  %s29_s28 = int_to_ptr.vmem [resolvable:$true] %s28_s28 }
  0x17   :  { %p353_p9 = scmp.lt.u32.totalorder %s349_s4, %s474_s1 }
  0x19   :  { %p355_p10 = pnand %p353_p9, %p350_p8 }
  0x1b   :  { %358 = shalt.err (!%p355_p10)
}
  0x1c   :  { %s359_s9 = scalar_lea.vmem %s29_s28, 2048  ;;  %p364_p12 = scmp.lt.s32.totalorder %s29_s28, %s29_s28 }
  0x1d   :  { %p360_p11 = scmp.ne.s32.totalorder %s29_s28, %s359_s9  ;;  %p365_p13 = scmp.lt.s32.totalorder %s359_s9, %s359_s9 }
  0x1f   :  { %p366_p0 = por %p365_p13, %p364_p12 }
  0x21   :  { %p367_p1 = pnand %p366_p0, %p360_p11 }
  0x23   :  { %370 = shalt.err (!%p367_p1)
}
  0x24   :  { %34 = dma.hbm_to_vmem [thread:$0]  %s474_s1, 2048, %s29_s28, [#allocation6], %s400_s23, %s400_s23, %s401_s24  }
  0x25   :  { %393 = dma.done.wait [#allocation3], 512  }
  0x26   :  { %394 = vsyncadd [#allocation3], 4294966784 }
  0x27   :  { %395 = dma.done.wait [#allocation6], 2048  }
  0x28   :  { %396 = vsyncadd [#allocation6], 4294965248  ;;  %v403_v0 = vmov 0   ;;  %v303_v1 = vld [vmem:[#allocation5 + $0x4] ss:$8 sps:$4 sm:$0xff]   ;;  %v46_v19 = vld [vmem:[#allocation2 + $0x10] sm:$0xff]  ;;  %v68_v23 = vlaneseq }
  0x29   :  { %190 = vmatprep.mubr.bf16.mxu0 %v403_v0  ;;  %200 = vmatprep.mubr.bf16.mxu1 %v403_v0  ;;  %v305_v2 = vld [vmem:[#allocation5] ss:$8 sps:$4 sm:$0xff]   ;;  %v306_v3 = vld [vmem:[#allocation5 + $0x14] ss:$8 sps:$4 sm:$0xff]   ;;  %v308_v4 = vld [vmem:[#allocation5 + $0x10] ss:$8 sps:$4 sm:$0xff]  }
  0x2a   :  { %158 = vmatprep.subr.bf16.mxu0 %v303_v1  ;;  %281 = vmatprep.subr.bf16.mxu1 %v303_v1  ;;  %v309_v5 = vld [vmem:[#allocation5 + $0x24] ss:$8 sps:$4 sm:$0xff]   ;;  %v311_v6 = vld [vmem:[#allocation5 + $0x20] ss:$8 sps:$4 sm:$0xff]   ;;  %v312_v7 = vld [vmem:[#allocation5 + $0x34] ss:$8 sps:$4 sm:$0xff]  }
  0x2b   :  { %159 = vmatpush1.bf16.msra.mxu0 %v305_v2  ;;  %289 = vmatpush1.bf16.msra.mxu1 %v305_v2  ;;  %v314_v8 = vld [vmem:[#allocation5 + $0x30] ss:$8 sps:$4 sm:$0xff]   ;;  %v315_v9 = vld [vmem:[#allocation5 + $0x44] ss:$8 sps:$4 sm:$0xff]   ;;  %v317_v10 = vld [vmem:[#allocation5 + $0x40] ss:$8 sps:$4 sm:$0xff]  }
  0x2c   :  { %160 = vmatprep.subr.bf16.mxu0 %v306_v3  ;;  %282 = vmatprep.subr.bf16.mxu1 %v306_v3  ;;  %v318_v11 = vld [vmem:[#allocation5 + $0x54] ss:$8 sps:$4 sm:$0xff]   ;;  %v320_v12 = vld [vmem:[#allocation5 + $0x50] ss:$8 sps:$4 sm:$0xff]   ;;  %v321_v13 = vld [vmem:[#allocation5 + $0x64] ss:$8 sps:$4 sm:$0xff]  }
  0x2d   :  { %v323_v14 = vld [vmem:[#allocation5 + $0x60] ss:$8 sps:$4 sm:$0xff]   ;;  %v324_v15 = vld [vmem:[#allocation5 + $0x74] ss:$8 sps:$4 sm:$0xff]   ;;  %v326_v16 = vld [vmem:[#allocation5 + $0x70] ss:$8 sps:$4 sm:$0xff]  }
  0x2e   :  { %v44_v17 = vld [vmem:[#allocation2] sm:$0xff]  ;;  %v45_v18 = vld [vmem:[#allocation2 + $0x8] sm:$0xff]  ;;  %v47_v20 = vld [vmem:[#allocation2 + $0x18] sm:$0xff]  ;;  %v69_v24 = vshrl.u32 %v68_v23, 7 }
  0x2f   :  { %161 = vmatpush1.bf16.msra.mxu0 %v308_v4  ;;  %290 = vmatpush1.bf16.msra.mxu1 %v308_v4  ;;  %v48_v21 = vpack.c.bf16 %v45_v18, %v44_v17  ;;  %v49_v22 = vpack.c.bf16 %v47_v20, %v46_v19  ;;  %v66_v26 = vld [vmem:[%s475_s2] sm:$0x3] }
  0x30   :  { %162 = vmatprep.subr.bf16.mxu0 %v309_v5  ;;  %283 = vmatprep.subr.bf16.mxu1 %v309_v5  ;;  %v70_v25 = vsub.s32 0, %v69_v24  ;;  %v74_v27 = vsub.s32 1, %v69_v24 }
  0x32   :  { %v71_v28 = vrot.slane %v66_v26, %v70_v25  ;;  %v75_v29 = vrot.slane %v66_v26, %v74_v27 }
  0x33   :  { %163 = vmatpush1.bf16.msra.mxu0 %v311_v6  ;;  %291 = vmatpush1.bf16.msra.mxu1 %v311_v6 }
  0x34   :  { %164 = vmatprep.subr.bf16.mxu0 %v312_v7  ;;  %284 = vmatprep.subr.bf16.mxu1 %v312_v7 }
  0x37   :  { %165 = vmatpush1.bf16.msra.mxu0 %v314_v8  ;;  %292 = vmatpush1.bf16.msra.mxu1 %v314_v8 }
  0x38   :  { %166 = vmatprep.subr.bf16.mxu0 %v315_v9  ;;  %285 = vmatprep.subr.bf16.mxu1 %v315_v9 }
  0x3b   :  { %167 = vmatpush1.bf16.msra.mxu0 %v317_v10  ;;  %293 = vmatpush1.bf16.msra.mxu1 %v317_v10 }
  0x3c   :  { %168 = vmatprep.subr.bf16.mxu0 %v318_v11  ;;  %286 = vmatprep.subr.bf16.mxu1 %v318_v11 }
  0x3f   :  { %169 = vmatpush1.bf16.msra.mxu0 %v320_v12  ;;  %294 = vmatpush1.bf16.msra.mxu1 %v320_v12 }
  0x40   :  { %170 = vmatprep.subr.bf16.mxu0 %v321_v13  ;;  %287 = vmatprep.subr.bf16.mxu1 %v321_v13 }
  0x43   :  { %171 = vmatpush1.bf16.msra.mxu0 %v323_v14  ;;  %295 = vmatpush1.bf16.msra.mxu1 %v323_v14 }
  0x44   :  { %172 = vmatprep.subr.bf16.mxu0 %v324_v15  ;;  %288 = vmatprep.subr.bf16.mxu1 %v324_v15 }
  0x47   :  { %173 = vmatpush1.bf16.msra.mxu0 %v326_v16  ;;  %296 = vmatpush1.bf16.msra.mxu1 %v326_v16 }
  0x4a   :  { %191 = vmatmul.mubr.bf16.vlgmr.msra.gmra.mrb[0].mxu0 %v48_v21  ;;  %201 = vmatmul.mubr.bf16.vlgmr.msra.gmra.mrb[0].mxu1 %v49_v22 }
 0x11d   :  { %v192_v30 = vpop.f32.mrb[0].mxu0  ;;  %v202_v31 = vpop.f32.mrb[0].mxu1 }
 0x11e   :  { %v193_v32 = vadd.f32 %v192_v30, %v71_v28  ;;  %v203_v33 = vadd.f32 %v202_v31, %v71_v28  ;;  %v194_v34 = vpop.f32.mrb[1].mxu0  ;;  %v204_v35 = vpop.f32.mrb[1].mxu1 }
 0x11f   :  { %v195_v36 = vadd.f32 %v194_v34, %v75_v29  ;;  %v205_v37 = vadd.f32 %v204_v35, %v75_v29  ;;  %v196_v38 = vpop.f32.mrb[2].mxu0  ;;  %v206_v39 = vpop.f32.mrb[2].mxu1 }
 0x120   :  { %v197_v40 = vadd.f32 %v196_v38, %v71_v28  ;;  %v207_v41 = vadd.f32 %v206_v39, %v71_v28  ;;  %v198_v42 = vpop.f32.mrb[3].mxu0  ;;  %v208_v43 = vpop.f32.mrb[3].mxu1 }
 0x121   :  { %v277_v44 = vpack.c.bf16 %v195_v36, %v193_v32  ;;  %v279_v45 = vpack.c.bf16 %v205_v37, %v203_v33  ;;  %v199_v46 = vadd.f32 %v198_v42, %v75_v29  ;;  %v209_v47 = vadd.f32 %v208_v43, %v75_v29 }
 0x123   :  { %235 = vst [vmem:[#allocation7] sm:$0xff] %v277_v44  ;;  %237 = vst [vmem:[#allocation7 + $0x10] sm:$0xff] %v279_v45  ;;  %v278_v48 = vpack.c.bf16 %v199_v46, %v197_v40  ;;  %v280_v49 = vpack.c.bf16 %v209_v47, %v207_v41 }
 0x125   :  { %236 = vst [vmem:[#allocation7 + $0x8] sm:$0xff] %v278_v48  ;;  %238 = vst [vmem:[#allocation7 + $0x18] sm:$0xff] %v280_v49 }
 0x126   :  { %243 = vsyncadd [#allocation4], 128  ;;  %s404_s2 = smov [#allocation7]  }
 0x127   :  { %s244_s12 = sshll.u32 %s404_s2, 4  ;;  %s245_s12 = int_to_ptr.vmem [resolvable:$true] %s244_s12 }
 0x128   :  { %s371_s13 = scalar_lea.vmem %s245_s12, 384  ;;  %s375_s14 = scalar_lea.vmem %s245_s12, 512 }
 0x129   :  { %p372_p2 = scmp.ne.s32.totalorder %s245_s12, %s371_s13  ;;  %p376_p3 = scmp.lt.s32.totalorder %s245_s12, %s245_s12 }
 0x12a   :  { %p377_p4 = scmp.lt.s32.totalorder %s375_s14, %s371_s13 }
 0x12c   :  { %p378_p5 = por %p377_p4, %p376_p3 }
 0x12e   :  { %p379_p6 = pnand %p378_p5, %p372_p2 }
 0x130   :  { %382 = shalt.err (!%p379_p6)
}
 0x131   :  { %s383_s17 = scalar_lea.hbm %s476_s3, 384 }
 0x132   :  { %p384_p7 = scmp.ne.s32.totalorder %s476_s3, %s383_s17  ;;  %p387_p8 = scmp.lt.u32.totalorder %s383_s17, %s476_s3 }
 0x134   :  { %p389_p9 = pnand %p387_p8, %p384_p7 }
 0x136   :  { %392 = shalt.err (!%p389_p9)
}
 0x137   :  { %250 = dma.vmem_to_hbm [thread:$0]  %s245_s12, 384, %s476_s3, [#allocation4], %s400_s23, %s400_s23, %s401_s24  }
 0x138   :  { %397 = dma.done.wait [#allocation4], 512  }
 0x139   :  { %398 = vsyncadd [#allocation4], 4294966784 }
 0x13a   :  { %254 = vsyncpa [#allocation3], 1 }
 0x13b   :  { %255 = vsyncpa [#allocation6], 1 }
 0x13c   :  { %256 = vsyncpa [#allocation4], 1 }

</bundles_post_ra>
